<compile_context>
chip_gen: v6e
topology: v6e:2x2x1
jax: 0.10.0
libtpu: 0.0.40
codegen_flags: <defaults>
</compile_context>

<pallas_src>
import functools

import jax
import jax.numpy as jnp
from jax.experimental import pallas as pl
from jax.experimental.pallas import tpu as pltpu


def _weighted_sum_kernel(w_ref, *refs, num_layers: int, normalize: bool):
    # w_ref    : SMEM (L,) softmax-normalized layer weights (f32, hoisted to wrapper)
    # refs[:L] : per-layer (tn, C) tiles (native dtype)
    # refs[L]  : (tn, C) output tile
    x_refs = refs[:num_layers]
    o_ref = refs[num_layers]

    acc = None
    for l in range(num_layers):                      # unrolled: L is small & static
        x = x_refs[l][...].astype(jnp.float32)
        if normalize:
            # F.layer_norm(x, (D,)): no affine, eps=1e-5, biased variance.
            # Two-pass (x - mean) for numerical stability; layer weight folded into
            # the per-row scale so there is no separate full-tile multiply by w.
            d = x.shape[-1]
            inv_d = jnp.float32(1.0 / d)
            mean = jnp.sum(x, axis=-1, keepdims=True) * inv_d
            xc = x - mean
            var = jnp.sum(xc * xc, axis=-1, keepdims=True) * inv_d
            scale = w_ref[l] * jax.lax.rsqrt(var + jnp.float32(1e-5))   # (tn, 1)
            term = xc * scale
        else:
            term = x * w_ref[l]                      # scalar (SMEM) * (tn, C)
        acc = term if acc is None else acc + term
    o_ref[...] = acc.astype(o_ref.dtype)


def _vmem_capacity_bytes(default: int = 64 * 1024 * 1024) -> int:
    """Physical per-TensorCore VMEM (generation-aware), conservative fallback."""
    try:
        info = pltpu.get_tpu_info()
        cap = getattr(info, "vmem_capacity_bytes", None)
        if cap:
            return int(cap)
    except Exception:
        pass
    return default


def _weighted_sum_2d(flats, norm_w, *, normalize: bool) -> jax.Array:
    """Weighted sum over L arrays of identical shape (R, C). Returns (R, C)."""
    L = len(flats)
    R, C = flats[0].shape
    dtype = flats[0].dtype
    itemsize = jnp.dtype(dtype).itemsize

    # Sublane packing multiple for this dtype (f32: 8, bf16: 16, int8/fp8: 32).
    row_mult = max(8, 32 // itemsize)
    # Lane padding of narrow last dims: a (tn, C) tile occupies tn * C_pad in VMEM.
    c_pad = pl.cdiv(C, 128) * 128

    # Generation-aware VMEM: v7x has 64 MiB/TC -> cap at ~48 MiB; v5e/v6e have
    # 128 MiB -> allow up to 96 MiB of scoped VMEM for big streaming tiles.
    vmem_cap = _vmem_capacity_bytes()
    vmem_limit = min(int(0.75 * vmem_cap), 96 * 1024 * 1024)
    budget = int(0.85 * vmem_limit)

    # Per-row VMEM bytes: double-buffered L inputs + output (native dtype, lane-padded)
    # plus ~3 f32 compute intermediates (accumulator, centered x, mean/var vectors).
    bytes_per_row = (2 * L + 2) * c_pad * itemsize + 3 * c_pad * 4

    if R <= row_mult:
        tn = R                                        # single full-extent block
    else:
        tn = max(row_mult, (budget // bytes_per_row) // row_mult * row_mult)
        # Keep at least 2 grid steps so the "parallel" axis can be split across both
        # TensorCores on v7x (per-step overhead ~0.35us is negligible, streaming kernel).
        half = pl.cdiv(pl.cdiv(R, 2), row_mult) * row_mult
        tn = min(tn, half)
    grid = (pl.cdiv(R, tn),)

    needed = (2 * L + 2) * tn * c_pad * itemsize + 3 * tn * c_pad * 4
    vmem_limit_bytes = int(min(vmem_limit, max(32 * 1024 * 1024, int(1.25 * needed))))

    return pl.pallas_call(
        functools.partial(_weighted_sum_kernel, num_layers=L, normalize=normalize),
        out_shape=jax.ShapeDtypeStruct((R, C), dtype),
        grid_spec=pltpu.PrefetchScalarGridSpec(
            num_scalar_prefetch=1,                    # norm_w -> SMEM
            grid=grid,
            in_specs=[pl.BlockSpec((tn, C), lambda i, w: (i, 0)) for _ in range(L)],
            out_specs=pl.BlockSpec((tn, C), lambda i, w: (i, 0)),
        ),
        compiler_params=pltpu.CompilerParams(
            dimension_semantics=("parallel",),
            vmem_limit_bytes=vmem_limit_bytes),
    )(norm_w, *flats)


def weighted_sum_pallas(feature_list, weights, *, normalize: bool = False) -> jax.Array:
    """feature_list: L arrays of shape (B, T, D); weights: (L,) raw (pre-softmax).
    Returns (B, T, D) in the input dtype."""
    L = len(feature_list)
    assert L >= 1
    B, T, D = feature_list[0].shape
    N = B * T

    # Hoist the softmax out of the kernel (computed once, passed via SMEM prefetch).
    norm_w = jax.nn.softmax(weights.astype(jnp.float32), axis=-1)

    # Lane-dense view for narrow D: without layer_norm the weighted sum is purely
    # elementwise, so any contiguous 2-D view works. Pick C a multiple of 128 that
    # divides N*D exactly (free reshape) -> full-lane vregs, unmasked stores,
    # no 4x lane padding of VMEM tiles.
    if (not normalize) and (D % 128 != 0):
        total = N * D
        for c in (1024, 512, 256, 128):
            if total % c == 0:
                flats = [f.reshape(total // c, c) for f in feature_list]
                out = _weighted_sum_2d(flats, norm_w, normalize=False)
                return out.reshape(B, T, D)

    flats = [f.reshape(N, D) for f in feature_list]   # free reshape (contiguous)
    out = _weighted_sum_2d(flats, norm_w, normalize=normalize)
    return out.reshape(B, T, D)


class FeaturizerJAX:
    """JAX/Pallas re-implementation of the Featurizer forward pass (weighted-sum mode)."""

    def __init__(self, layer_num: int, feat_dim: int, downsample_rate: int,
                 normalize: bool = False):
        self.layer_num = layer_num
        self.output_dim = feat_dim
        self.downsample_rate = downsample_rate
        self.normalize = normalize
        # nn.Parameter(torch.zeros(layer_num)) -> deterministic zero init
        self.weights = jnp.zeros((layer_num,), dtype=jnp.float32)

    def _weighted_sum(self, feature_list):
        assert self.layer_num == len(feature_list)
        return weighted_sum_pallas(list(feature_list), self.weights,
                                   normalize=self.normalize)

    def tolist(self, paired_wavs, paired_feature):
        assert paired_feature.ndim == 3
        feature_len = [round(len(w) / self.downsample_rate) for w in paired_wavs]
        length_diff = abs(paired_feature.shape[1]
                          - round(max(len(w) for w in paired_wavs) / self.downsample_rate))
        assert length_diff < 5, f"{length_diff} >= 5"
        # TODO(synk): ragged per-wav slicing stays host-side JAX glue (as in torch).
        return [f[:l] for f, l in zip(paired_feature, feature_len)]

    def forward(self, paired_wavs, paired_features):
        feature = paired_features["hidden_states"]
        if isinstance(feature, (list, tuple)):
            feature = self._weighted_sum(list(feature))
        return self.tolist(paired_wavs, feature)


def _reference_weighted_sum(feature_list, weights, normalize):
    x = jnp.stack(feature_list, axis=0).astype(jnp.float32)
    if normalize:
        mean = jnp.mean(x, axis=-1, keepdims=True)
        var = jnp.mean((x - mean) ** 2, axis=-1, keepdims=True)
        x = (x - mean) / jnp.sqrt(var + 1e-5)
    nw = jax.nn.softmax(weights.astype(jnp.float32), axis=-1)
    return jnp.sum(nw[:, None, None, None] * x, axis=0)


if __name__ == "__main__":
    key = jax.random.PRNGKey(0)

    # Small synthetic "upstream" output: L hidden-state layers of shape (B, T, D).
    # T=9 makes B*T*D=576 indivisible by 128 and B*T=18 a non-multiple of the row
    # tile -> exercises the ragged-last-block (masked store) path.
    L, B, T, D = 4, 2, 9, 32
    downsample_rate = 160

    keys = jax.random.split(key, L + 2)
    hidden_states = [jax.random.normal(keys[i], (B, T, D), dtype=jnp.float32)
                     for i in range(L)]
    wav_lens = [T * downsample_rate, (T - 2) * downsample_rate]
    paired_wavs = [jax.random.normal(keys[L], (wav_lens[0],)),
                   jax.random.normal(keys[L + 1], (wav_lens[1],))]
    paired_features = {"hidden_states": hidden_states}

    # --- normalize=False (f32, ragged tail) ---
    featurizer = FeaturizerJAX(layer_num=L, feat_dim=D,
                               downsample_rate=downsample_rate, normalize=False)
    feats = featurizer.forward(paired_wavs, paired_features)
    feats = [jax.block_until_ready(f) for f in feats]
    ref = _reference_weighted_sum(hidden_states, featurizer.weights, normalize=False)
    for b, (got, w) in enumerate(zip(feats, paired_wavs)):
        want = ref[b, :round(len(w) / downsample_rate)]
        assert got.shape == want.shape, (got.shape, want.shape)
        assert jnp.max(jnp.abs(got - want)) < 1e-5

    # --- normalize=True (f32, ragged tail; garbage pad rows never stored) ---
    featurizer_norm = FeaturizerJAX(layer_num=L, feat_dim=D,
                                    downsample_rate=downsample_rate, normalize=True)
    feats_norm = featurizer_norm.forward(paired_wavs, paired_features)
    feats_norm = [jax.block_until_ready(f) for f in feats_norm]
    ref_n = _reference_weighted_sum(hidden_states, featurizer_norm.weights, normalize=True)
    for b, (got, w) in enumerate(zip(feats_norm, paired_wavs)):
        want = ref_n[b, :round(len(w) / downsample_rate)]
        assert jnp.max(jnp.abs(got - want)) < 1e-4

    # --- bf16 inputs stay bf16 through the DMA (normalize=False) ---
    hidden_bf16 = [h.astype(jnp.bfloat16) for h in hidden_states]
    feats_bf16 = featurizer.forward(paired_wavs, {"hidden_states": hidden_bf16})
    feats_bf16 = [jax.block_until_ready(f) for f in feats_bf16]
    ref_b = _reference_weighted_sum(hidden_bf16, featurizer.weights, normalize=False)
    for b, (got, w) in enumerate(zip(feats_bf16, paired_wavs)):
        assert got.dtype == jnp.bfloat16
        want = ref_b[b, :round(len(w) / downsample_rate)]
        assert jnp.max(jnp.abs(got.astype(jnp.float32) - want)) < 3e-2

    # --- lane-dense path: D=32, B*T*D = 512 divisible by 128 -> (rows, 512) view ---
    hs_ld = [jax.random.normal(keys[i], (B, 8, D), dtype=jnp.float32) for i in range(L)]
    w_ld = 0.1 * jax.random.normal(keys[L], (L,), dtype=jnp.float32)
    out_ld = jax.block_until_ready(weighted_sum_pallas(hs_ld, w_ld, normalize=False))
    ref_ld = _reference_weighted_sum(hs_ld, w_ld, normalize=False)
    assert jnp.max(jnp.abs(out_ld - ref_ld)) < 1e-5

    # --- lane-aligned D=128 with normalize=True (real featurizer dims are multiples of 128) ---
    hs_128 = [jax.random.normal(keys[i], (B, T, 128), dtype=jnp.float32) for i in range(L)]
    w_128 = 0.1 * jax.random.normal(keys[L + 1], (L,), dtype=jnp.float32)
    out_128 = jax.block_until_ready(weighted_sum_pallas(hs_128, w_128, normalize=True))
    ref_128 = _reference_weighted_sum(hs_128, w_128, normalize=True)
    assert jnp.max(jnp.abs(out_128 - ref_128)) < 1e-4

    print("KERNEL_OK")
</pallas_src>

<mosaic_0001>
module attributes {stable_mosaic.version = 11 : i64} {
  func.func @_weighted_sum_kernel(%arg0: i32, %arg1: memref<4xf32, #tpu.memory_space<smem>>, %arg2: memref<16x32xf32, #tpu.memory_space<vmem>>, %arg3: memref<16x32xf32, #tpu.memory_space<vmem>>, %arg4: memref<16x32xf32, #tpu.memory_space<vmem>>, %arg5: memref<16x32xf32, #tpu.memory_space<vmem>>, %arg6: memref<16x32xf32, #tpu.memory_space<vmem>>) attributes {dimension_semantics = [#tpu.dimension_semantics<parallel>], iteration_bounds = array<i64: 2>, scalar_prefetch = 1 : i64, scratch_operands = 0 : i64, tpu.core_type = #tpu.core_type<tc>, window_params = [{transform_indices = @transform_0, window_bounds = array<i64: 16, 32>}, {transform_indices = @transform_1, window_bounds = array<i64: 16, 32>}, {transform_indices = @transform_2, window_bounds = array<i64: 16, 32>}, {transform_indices = @transform_3, window_bounds = array<i64: 16, 32>}, {transform_indices = @transform_4, window_bounds = array<i64: 16, 32>}]} {
    %c0 = arith.constant 0 : index
    %c0_0 = arith.constant 0 : index
    %0 = vector.load %arg2[%c0, %c0_0] : memref<16x32xf32, #tpu.memory_space<vmem>>, vector<16x32xf32>
    %c0_1 = arith.constant 0 : index
    %1 = memref.load %arg1[%c0_1] : memref<4xf32, #tpu.memory_space<smem>>
    %2 = vector.broadcast %1 : f32 to vector<16x32xf32>
    %3 = arith.mulf %0, %2 : vector<16x32xf32>
    %c0_2 = arith.constant 0 : index
    %c0_3 = arith.constant 0 : index
    %4 = vector.load %arg3[%c0_2, %c0_3] : memref<16x32xf32, #tpu.memory_space<vmem>>, vector<16x32xf32>
    %c1 = arith.constant 1 : index
    %5 = memref.load %arg1[%c1] : memref<4xf32, #tpu.memory_space<smem>>
    %6 = vector.broadcast %5 : f32 to vector<16x32xf32>
    %7 = arith.mulf %4, %6 : vector<16x32xf32>
    %8 = arith.addf %3, %7 : vector<16x32xf32>
    %c0_4 = arith.constant 0 : index
    %c0_5 = arith.constant 0 : index
    %9 = vector.load %arg4[%c0_4, %c0_5] : memref<16x32xf32, #tpu.memory_space<vmem>>, vector<16x32xf32>
    %c2 = arith.constant 2 : index
    %10 = memref.load %arg1[%c2] : memref<4xf32, #tpu.memory_space<smem>>
    %11 = vector.broadcast %10 : f32 to vector<16x32xf32>
    %12 = arith.mulf %9, %11 : vector<16x32xf32>
    %13 = arith.addf %8, %12 : vector<16x32xf32>
    %c0_6 = arith.constant 0 : index
    %c0_7 = arith.constant 0 : index
    %14 = vector.load %arg5[%c0_6, %c0_7] : memref<16x32xf32, #tpu.memory_space<vmem>>, vector<16x32xf32>
    %c3 = arith.constant 3 : index
    %15 = memref.load %arg1[%c3] : memref<4xf32, #tpu.memory_space<smem>>
    %16 = vector.broadcast %15 : f32 to vector<16x32xf32>
    %17 = arith.mulf %14, %16 : vector<16x32xf32>
    %18 = arith.addf %13, %17 : vector<16x32xf32>
    %c0_8 = arith.constant 0 : index
    %c0_9 = arith.constant 0 : index
    %19 = vector.load %arg6[%c0_8, %c0_9] : memref<16x32xf32, #tpu.memory_space<vmem>>, vector<16x32xf32>
    tpu.vector_store %arg6[%c0_8, %c0_9], %18 {strides = array<i32>} : memref<16x32xf32, #tpu.memory_space<vmem>>, vector<16x32xf32>,
    return
  }
  func.func @transform_0(%arg0: i32, %arg1: memref<4xf32, #tpu.memory_space<smem>>) -> (i32, i32) {
    %c0_i32 = arith.constant 0 : i32
    %c0_i32_0 = arith.constant 0 : i32
    return %arg0, %c0_i32 : i32, i32
  }
  func.func @transform_1(%arg0: i32, %arg1: memref<4xf32, #tpu.memory_space<smem>>) -> (i32, i32) {
    %c0_i32 = arith.constant 0 : i32
    %c0_i32_0 = arith.constant 0 : i32
    return %arg0, %c0_i32 : i32, i32
  }
  func.func @transform_2(%arg0: i32, %arg1: memref<4xf32, #tpu.memory_space<smem>>) -> (i32, i32) {
    %c0_i32 = arith.constant 0 : i32
    %c0_i32_0 = arith.constant 0 : i32
    return %arg0, %c0_i32 : i32, i32
  }
  func.func @transform_3(%arg0: i32, %arg1: memref<4xf32, #tpu.memory_space<smem>>) -> (i32, i32) {
    %c0_i32 = arith.constant 0 : i32
    %c0_i32_0 = arith.constant 0 : i32
    return %arg0, %c0_i32 : i32, i32
  }
  func.func @transform_4(%arg0: i32, %arg1: memref<4xf32, #tpu.memory_space<smem>>) -> (i32, i32) {
    %c0_i32 = arith.constant 0 : i32
    %c0_i32_0 = arith.constant 0 : i32
    return %arg0, %c0_i32 : i32, i32
  }
}

</mosaic_0001>

<bundles_post_ra>
// kernel: tpu_custom_call.1
= control target key start
LH: loop header
LB: loop body
LE: loop exit
PB: predicated region body
PF: predicated region fallthrough
CT: control target
= control target key end

     0   :  { %s874_s18 = smov [#allocation3]   ;;  %s1245_s0 = inlined_call_operand.hbm [shape: f32[4], index: 0, kind: input, shape index: {}]   ;;  %s1246_s1 = inlined_call_operand.hbm [shape: f32[18,32], index: 1, kind: input, shape index: {}]   ;;  %s1247_s2 = inlined_call_operand.hbm [shape: f32[18,32], index: 2, kind: input, shape index: {}]   ;;  %s1248_s3 = inlined_call_operand.hbm [shape: f32[18,32], index: 3, kind: input, shape index: {}]   ;;  %s1249_s4 = inlined_call_operand.hbm [shape: f32[18,32], index: 4, kind: input, shape index: {}]   ;;  %s1250_s5 = inlined_call_operand.hbm [shape: f32[18,32], index: 5, kind: output, shape index: {}]  }
   0x1   :  { %11 = dma.hbm_to_smem %s1245_s0, 16, %s874_s18, [#allocation2] }
   0x2   :  { %840 = dma.done.wait [#allocation2], 16 }
   0x3   :  { %841 = vsyncadd [#allocation2], 4294967280 }
   0x4   :  { %13 = sfence }
   0x5   :  { %14 = vsyncpa [#allocation5], 0 }
   0x6   :  { %16 = vsyncpa [#allocation5 + $0x1], 0 }
   0x7   :  { %17 = vsyncpa [#allocation8], 0 }
   0x8   :  { %19 = vsyncpa [#allocation8 + $0x1], 0 }
   0x9   :  { %20 = vsyncpa [#allocation11], 0 }
   0xa   :  { %22 = vsyncpa [#allocation11 + $0x1], 0 }
   0xb   :  { %23 = vsyncpa [#allocation6], 0 }
   0xc   :  { %25 = vsyncpa [#allocation6 + $0x1], 0  ;;  %s923_s21 = smov 0   ;;  %s925_s22 = smov 0  }
   0xd   :  { %s927_s23 = smov 0   ;;  %s929_s24 = smov 0  }
   0xe LB: > { %s944_s0 = sadd.s32 4294967295, %s872_s24   ;;  %s579_s25 = sadd.s32 4294967294, %s872_s24   ;;  %s872_s24 = sphi %s929_s24, %s1262_s24   ;;  %s868_s23 = sphi %s927_s23, %s1261_s23   ;;  %s864_s22 = sphi %s925_s22, %s1260_s22   ;;  %s860_s21 = sphi %s923_s21, %s1259_s21  }
   0xf   : > { %s948_s26 = sadd.s32 1, %s872_s24   ;;  %s38_s27 = sadd.s32 1, %s868_s23 }
  0x10   : > { %s35_s28 = ssub.s32 %s872_s24, %s948_s26  ;;  %p45_p0 = scmp.ne.s32.totalorder %s868_s23, %s864_s22 }
  0x11   : > { %p36_p1 = scmp.eq.s32.totalorder %s35_s28, 0  ;;  %p46_p2 = scmp.eq.s32.totalorder %s872_s24, 0 }
  0x12   : > { %p51_p3 = scmp.ne.s32.totalorder %s864_s22, %s860_s21  ;;  %p52_p4 = scmp.eq.s32.totalorder %s944_s0, 0 }
  0x13   : > { %s960_s29 = scalar_select %p36_p1, %s868_s23, %s38_s27  }
  0x14   : > { %p962_p5 = por %p46_p2, %p45_p0  ;;  %p966_p6 = por %p52_p4, %p51_p3 }
  0x15   : > { %p153_p7 = scmp.eq.s32.totalorder %s944_s0, 1  ;;  %p159_p8 = scmp.eq.s32.totalorder %s579_s25, 1 }
  0x16   : > { %p1251_p11 = scmp.ge.s32.totalorder %s872_s24, 2 }
  0x17   : > { %p971_p9 = por %p153_p7, %p45_p0  ;;  %p975_p10 = por %p159_p8, %p51_p3 }
  0x18   : > { %175 = sbr.rel (%p1251_p11) target bundleno = 157 (0x9d), region = 16 }
  0x19   : > { %s1254_s7 = scalar_select %p971_p9, 1, 0 }
  0x1a   : > { %s1255_s8 = scalar_select %p975_p10, 1, 0 }
  0x1d   : > { %178 = sbr.rel (!%p962_p5) target bundleno = 61 (0x3d), region = 20  ;;  %s179_s9 = sand.u32 (%p962_p5), 1, %s868_s23  }
  0x1e   : > { %s583_s10 = sshll.u32 (%p962_p5), %s872_s24, 1  ;;  %s582_s11 = sshll.u32 (%p962_p5), %s179_s9, 4 }
  0x1f   : > { %s185_s12 = ssub.s32 (%p962_p5), 3, %s583_s10  ;;  %s989_s15 = scalar_lea.sflag (%p962_p5), [#allocation5], %s179_s9 }
  0x20   : > { %p186_p12 = scmp.lt.s32.totalorder (%p962_p5), %s185_s12, 2  ;;  %s183_s16 = scalar_lea.vmem (%p962_p5), [#allocation4], %s582_s11 }
  0x22   : > { %s1264_s12 = smov (!%p186_p12, %s185_s12), 2 }
  0x23   : > { %s986_s13 = sshll.u32 %s1264_s12, 7 }
  0x24   : > { %s190_s14 = ssub.s32 256, %s986_s13 }
  0x25   : > { %191 = vsyncadd %s989_s15, %s190_s14  ;;  %p585_p13 = scmp.ne.s32.totalorder %s986_s13, 0  ;;  %s628_s17 = sshll.u32 %s872_s24, 8 }
  0x26   : > { %s997_s20 = scalar_lea.hbm %s1246_s1, %s628_s17  ;;  %s196_s25 = sshll.u32 %s183_s16, 4  ;;  %s999_s25 = int_to_ptr.vmem [resolvable:$true] %s196_s25 }
  0x27   : > { %s694_s27 = scalar_lea.hbm %s997_s20, %s986_s13  ;;  %s698_s10 = scalar_lea.hbm %s1246_s1, 384 }
  0x28   : > { %p695_p0 = scmp.ne.s32.totalorder %s997_s20, %s694_s27  ;;  %p699_p3 = scmp.lt.s32.totalorder %s997_s20, %s1246_s1 }
  0x29   : > { %p700_p4 = scmp.lt.s32.totalorder %s698_s10, %s694_s27 }
  0x2a   : > { %p696_p1 = pnand %p695_p0, %p585_p13 }
  0x2b   : > { %p701_p7 = por %p700_p4, %p699_p3 }
  0x2c   : > { %p697_p2 = pneg %p696_p1 }
  0x2e   : > { %p702_p8 = pnand %p701_p7, %p697_p2 }
  0x30   : > { %705 = shalt.err (!%p702_p8)
}
  0x31   : > { %s706_s14 = scalar_lea.vmem %s999_s25, %s986_s13  ;;  %s875_s16 = smov [#allocation4]  }
  0x32   : > { %p707_p12 = scmp.ne.s32.totalorder %s999_s25, %s706_s14  ;;  %s710_s17 = sshll.u32 %s875_s16, 4  ;;  %s711_s17 = int_to_ptr.vmem [resolvable:$false] %s710_s17 }
  0x33   : > { %s712_s18 = scalar_lea.vmem %s711_s17, 512  ;;  %p713_p11 = scmp.lt.s32.totalorder %s999_s25, %s711_s17 }
  0x34   : > { %p708_p0 = pnand %p707_p12, %p585_p13  ;;  %p714_p10 = scmp.lt.s32.totalorder %s712_s18, %s706_s14 }
  0x36   : > { %p709_p1 = pneg %p708_p0  ;;  %p715_p9 = por %p714_p10, %p713_p11 }
  0x38   : > { %p716_p3 = pnand %p715_p9, %p709_p1 }
  0x3a   : > { %719 = shalt.err (!%p716_p3)
}
  0x3b   : > { %s876_s19 = smov 128   ;;  %s877_s27 = smov 8  }
  0x3c   : > { %202 = dma.hbm_to_vmem [thread:$0]  (%p585_p13), %s997_s20, %s986_s13, %s999_s25, %s989_s15, %s876_s19, %s876_s19, %s877_s27  }
  0x3d PF: > { %205 = sbr.rel (!%p962_p5) target bundleno = 93 (0x5d), region = 24  ;;  %s206_s28 = sand.u32 (%p962_p5), 1, %s872_s24  }
  0x3e   : > { %s208_s9 = sand.u32 (%p962_p5), 1, %s868_s23   ;;  %s590_s11 = sshll.u32 (%p962_p5), %s872_s24, 1 }
  0x3f   : > { %s589_s10 = sshll.u32 (%p962_p5), %s208_s9, 4  ;;  %s212_s12 = ssub.s32 (%p962_p5), 3, %s590_s11 }
  0x40   : > { %p213_p9 = scmp.lt.s32.totalorder (%p962_p5), %s212_s12, 2  ;;  %s1033_s17 = scalar_lea.sflag (%p962_p5), [#allocation8], %s206_s28 }
  0x41   : > { %s210_s13 = scalar_lea.vmem (%p962_p5), [#allocation7], %s589_s10 }
  0x42   : > { %s1266_s12 = smov (!%p213_p9, %s212_s12), 2 }
  0x43   : > { %s1030_s14 = sshll.u32 %s1266_s12, 7 }
  0x44   : > { %s217_s16 = ssub.s32 256, %s1030_s14 }
  0x45   : > { %218 = vsyncadd %s1033_s17, %s217_s16  ;;  %p592_p10 = scmp.ne.s32.totalorder %s1030_s14, 0  ;;  %s629_s15 = sshll.u32 %s872_s24, 8 }
  0x46   : > { %s1041_s18 = scalar_lea.hbm %s1247_s2, %s629_s15  ;;  %s223_s19 = sshll.u32 %s210_s13, 4  ;;  %s1043_s19 = int_to_ptr.vmem [resolvable:$true] %s223_s19 }
  0x47   : > { %s720_s27 = scalar_lea.hbm %s1041_s18, %s1030_s14  ;;  %s724_s10 = scalar_lea.hbm %s1247_s2, 384 }
  0x48   : > { %p721_p11 = scmp.ne.s32.totalorder %s1041_s18, %s720_s27  ;;  %p725_p4 = scmp.lt.s32.totalorder %s1041_s18, %s1247_s2 }
  0x49   : > { %p726_p7 = scmp.lt.s32.totalorder %s724_s10, %s720_s27 }
  0x4a   : > { %p722_p13 = pnand %p721_p11, %p592_p10 }
  0x4b   : > { %p727_p8 = por %p726_p7, %p725_p4 }
  0x4c   : > { %p723_p2 = pneg %p722_p13 }
  0x4e   : > { %p728_p12 = pnand %p727_p8, %p723_p2 }
  0x50   : > { %731 = shalt.err (!%p728_p12)
}
  0x51   : > { %s732_s16 = scalar_lea.vmem %s1043_s19, %s1030_s14  ;;  %s878_s13 = smov [#allocation7]  }
  0x52   : > { %p733_p0 = scmp.ne.s32.totalorder %s1043_s19, %s732_s16  ;;  %s736_s15 = sshll.u32 %s878_s13, 4  ;;  %s737_s15 = int_to_ptr.vmem [resolvable:$false] %s736_s15 }
  0x53   : > { %s738_s20 = scalar_lea.vmem %s737_s15, 512  ;;  %p739_p9 = scmp.lt.s32.totalorder %s1043_s19, %s737_s15 }
  0x54   : > { %p734_p1 = pnand %p733_p0, %p592_p10  ;;  %p740_p11 = scmp.lt.s32.totalorder %s738_s20, %s732_s16 }
  0x56   : > { %p735_p3 = pneg %p734_p1  ;;  %p741_p13 = por %p740_p11, %p739_p9 }
  0x58   : > { %p742_p4 = pnand %p741_p13, %p735_p3 }
  0x5a   : > { %745 = shalt.err (!%p742_p4)
}
  0x5b   : > { %s879_s25 = smov 128   ;;  %s880_s27 = smov 8  }
  0x5c   : > { %229 = dma.hbm_to_vmem [thread:$0]  (%p592_p10), %s1041_s18, %s1030_s14, %s1043_s19, %s1033_s17, %s879_s25, %s879_s25, %s880_s27  }
  0x5d PF: > { %232 = sbr.rel (!%p962_p5) target bundleno = 125 (0x7d), region = 28  ;;  %s233_s28 = sand.u32 (%p962_p5), 1, %s872_s24  }
  0x5e   : > { %s235_s9 = sand.u32 (%p962_p5), 1, %s868_s23   ;;  %s597_s11 = sshll.u32 (%p962_p5), %s872_s24, 1 }
  0x5f   : > { %s596_s10 = sshll.u32 (%p962_p5), %s235_s9, 4  ;;  %s239_s12 = ssub.s32 (%p962_p5), 3, %s597_s11 }
  0x60   : > { %p240_p2 = scmp.lt.s32.totalorder (%p962_p5), %s239_s12, 2  ;;  %s1077_s15 = scalar_lea.sflag (%p962_p5), [#allocation8], %s233_s28 }
  0x61   : > { %s237_s14 = scalar_lea.vmem (%p962_p5), [#allocation9], %s596_s10 }
  0x62   : > { %s1268_s12 = smov (!%p240_p2, %s239_s12), 2 }
  0x63   : > { %s1074_s16 = sshll.u32 %s1268_s12, 7 }
  0x64   : > { %s244_s13 = ssub.s32 256, %s1074_s16 }
  0x65   : > { %245 = vsyncadd %s1077_s15, %s244_s13  ;;  %p599_p10 = scmp.ne.s32.totalorder %s1074_s16, 0  ;;  %s630_s17 = sshll.u32 %s872_s24, 8 }
  0x66   : > { %s1085_s20 = scalar_lea.hbm %s1248_s3, %s630_s17  ;;  %s250_s25 = sshll.u32 %s237_s14, 4  ;;  %s1087_s25 = int_to_ptr.vmem [resolvable:$true] %s250_s25 }
  0x67   : > { %s746_s27 = scalar_lea.hbm %s1085_s20, %s1074_s16  ;;  %s750_s10 = scalar_lea.hbm %s1248_s3, 384 }
  0x68   : > { %p747_p7 = scmp.ne.s32.totalorder %s1085_s20, %s746_s27  ;;  %p751_p0 = scmp.lt.s32.totalorder %s1085_s20, %s1248_s3 }
  0x69   : > { %p752_p1 = scmp.lt.s32.totalorder %s750_s10, %s746_s27 }
  0x6a   : > { %p748_p8 = pnand %p747_p7, %p599_p10 }
  0x6b   : > { %p753_p3 = por %p752_p1, %p751_p0 }
  0x6c   : > { %p749_p12 = pneg %p748_p8 }
  0x6e   : > { %p754_p9 = pnand %p753_p3, %p749_p12 }
  0x70   : > { %757 = shalt.err (!%p754_p9)
}
  0x71   : > { %s758_s13 = scalar_lea.vmem %s1087_s25, %s1074_s16  ;;  %s881_s14 = smov [#allocation9]  }
  0x72   : > { %p759_p11 = scmp.ne.s32.totalorder %s1087_s25, %s758_s13  ;;  %s762_s17 = sshll.u32 %s881_s14, 4  ;;  %s763_s17 = int_to_ptr.vmem [resolvable:$false] %s762_s17 }
  0x73   : > { %s764_s18 = scalar_lea.vmem %s763_s17, 512  ;;  %p765_p2 = scmp.lt.s32.totalorder %s1087_s25, %s763_s17 }
  0x74   : > { %p760_p13 = pnand %p759_p11, %p599_p10  ;;  %p766_p7 = scmp.lt.s32.totalorder %s764_s18, %s758_s13 }
  0x76   : > { %p761_p4 = pneg %p760_p13  ;;  %p767_p8 = por %p766_p7, %p765_p2 }
  0x78   : > { %p768_p0 = pnand %p767_p8, %p761_p4 }
  0x7a   : > { %771 = shalt.err (!%p768_p0)
}
  0x7b   : > { %s882_s19 = smov 128   ;;  %s883_s27 = smov 8  }
  0x7c   : > { %256 = dma.hbm_to_vmem [thread:$0]  (%p599_p10), %s1085_s20, %s1074_s16, %s1087_s25, %s1077_s15, %s882_s19, %s882_s19, %s883_s27  }
  0x7d PF: > { %259 = sbr.rel (!%p962_p5) target bundleno = 157 (0x9d), region = 32  ;;  %s260_s28 = sand.u32 (%p962_p5), 1, %s868_s23  }
  0x7e   : > { %s604_s9 = sshll.u32 (%p962_p5), %s872_s24, 1  ;;  %s603_s10 = sshll.u32 (%p962_p5), %s260_s28, 4 }
  0x7f   : > { %s266_s11 = ssub.s32 (%p962_p5), 3, %s604_s9  ;;  %s1120_s14 = scalar_lea.sflag (%p962_p5), [#allocation11], %s260_s28 }
  0x80   : > { %p267_p12 = scmp.lt.s32.totalorder (%p962_p5), %s266_s11, 2  ;;  %s264_s16 = scalar_lea.vmem (%p962_p5), [#allocation10], %s603_s10 }
  0x82   : > { %s1270_s11 = smov (!%p267_p12, %s266_s11), 2 }
  0x83   : > { %s1117_s12 = sshll.u32 %s1270_s11, 7 }
  0x84   : > { %s271_s13 = ssub.s32 256, %s1117_s12 }
  0x85   : > { %272 = vsyncadd %s1120_s14, %s271_s13  ;;  %p606_p5 = scmp.ne.s32.totalorder %s1117_s12, 0  ;;  %s631_s30 = sshll.u32 %s872_s24, 8 }
  0x86   : > { %s1128_s25 = scalar_lea.hbm %s1249_s4, %s631_s30  ;;  %s277_s17 = sshll.u32 %s264_s16, 4  ;;  %s1130_s17 = int_to_ptr.vmem [resolvable:$true] %s277_s17 }
  0x87   : > { %s772_s18 = scalar_lea.hbm %s1128_s25, %s1117_s12  ;;  %s776_s28 = scalar_lea.hbm %s1249_s4, 384 }
  0x88   : > { %p773_p10 = scmp.ne.s32.totalorder %s1128_s25, %s772_s18  ;;  %p777_p9 = scmp.lt.s32.totalorder %s1128_s25, %s1249_s4 }
  0x89   : > { %p778_p11 = scmp.lt.s32.totalorder %s776_s28, %s772_s18 }
  0x8a   : > { %p774_p1 = pnand %p773_p10, %p606_p5 }
  0x8b   : > { %p779_p13 = por %p778_p11, %p777_p9 }
  0x8c   : > { %p775_p3 = pneg %p774_p1 }
  0x8e   : > { %p780_p4 = pnand %p779_p13, %p775_p3 }
  0x90   : > { %783 = shalt.err (!%p780_p4)
}
  0x91   : > { %s784_s11 = scalar_lea.vmem %s1130_s17, %s1117_s12  ;;  %s884_s13 = smov [#allocation10]  }
  0x92   : > { %p785_p2 = scmp.ne.s32.totalorder %s1130_s17, %s784_s11  ;;  %s788_s16 = sshll.u32 %s884_s13, 4  ;;  %s789_s16 = int_to_ptr.vmem [resolvable:$false] %s788_s16 }
  0x93   : > { %s790_s30 = scalar_lea.vmem %s789_s16, 512  ;;  %p791_p0 = scmp.lt.s32.totalorder %s1130_s17, %s789_s16 }
  0x94   : > { %p786_p7 = pnand %p785_p2, %p606_p5  ;;  %p792_p12 = scmp.lt.s32.totalorder %s790_s30, %s784_s11 }
  0x96   : > { %p787_p8 = pneg %p786_p7  ;;  %p793_p10 = por %p792_p12, %p791_p0 }
  0x98   : > { %p794_p1 = pnand %p793_p10, %p787_p8 }
  0x9a   : > { %797 = shalt.err (!%p794_p1)
}
  0x9b   : > { %s885_s15 = smov 128   ;;  %s886_s20 = smov 8  }
  0x9c   : > { %283 = dma.hbm_to_vmem [thread:$0]  (%p606_p5), %s1128_s25, %s1117_s12, %s1130_s17, %s1120_s14, %s885_s15, %s885_s15, %s886_s20  }
  0x9d PF: > { %p610_p3 = scmp.ge.s32.totalorder %s872_s24, 1  ;;  %p285_p9 = scmp.lt.s32.totalorder %s872_s24, 3 }
  0x9f   : > { %p286_p11 = pnand %p610_p3, %p285_p9 }
  0xa0   : > { %s1159_s18 = sand.u32 (!%p286_p11), 1, %s864_s22  }
  0xa1   : > { %289 = sbr.rel (%p286_p11) target bundleno = 217 (0xd9), region = 36  ;;  %s1162_s19 = sshll.u32 (!%p286_p11), %s1159_s18, 4 }
  0xa2   : > { %s292_s27 = scalar_lea.sflag (!%p286_p11), [#allocation5], %s1159_s18  ;;  %s295_s28 = scalar_lea.vmem (!%p286_p11), [#allocation4], %s1162_s19 }
  0xa6   : > { %843 = dma.done.wait (%p966_p6), %s292_s27, 256  }
  0xa7   : > { %845 = vsyncadd (%p966_p6), %s292_s27, 4294967040  ;;  %s300_s12 = sand.u32 1, %s944_s0   ;;  %s304_s25 = scalar_lea.vmem [#allocation7], %s1162_s19 }
  0xa8   : > { %s301_s14 = scalar_lea.sflag [#allocation8], %s300_s12 }
  0xa9   : > { %847 = dma.done.wait (%p966_p6), %s301_s14, 512  }
  0xaa   : > { %849 = vsyncadd (%p966_p6), %s301_s14, 4294966784  ;;  %s313_s17 = scalar_lea.vmem [#allocation9], %s1162_s19  ;;  %s319_s9 = scalar_lea.sflag [#allocation11], %s1159_s18 }
  0xab   : > { %s322_s10 = scalar_lea.vmem [#allocation10], %s1162_s19 }
  0xac   : > { %851 = dma.done.wait (%p966_p6), %s319_s9, 256  }
  0xad   : > { %853 = vsyncadd (%p966_p6), %s319_s9, 4294967040  ;;  %s389_s11 = sld [smem:[#allocation3]]  ;;  %v387_v0 = vld [vmem:[%s295_s28] sm:$0xff]  ;;  %v388_v7 = vld [vmem:[%s295_s28 + $0x8] sm:$0xff]  ;;  %vm417_vm0 = vcmask 261120   ;;  %s361_s6 = scalar_lea.vmem [#allocation12], %s1162_s19 }
  0xae   : > { %s616_s13 = sld [smem:[#allocation3 + $0x1]]  ;;  %v393_v2 = vld [vmem:[%s304_s25] sm:$0xff]  ;;  %v394_v8 = vld [vmem:[%s304_s25 + $0x8] sm:$0xff]  ;;  %s421_s15 = scalar_lea.sflag [#allocation6], %s1159_s18 }
  0xaf   : > { %s617_s16 = sld [smem:[#allocation3 + $0x2]]  ;;  %v401_v3 = vld [vmem:[%s313_s17] sm:$0xff]  ;;  %v402_v13 = vld [vmem:[%s313_s17 + $0x8] sm:$0xff]  ;;  %p1256_p6 = scmp.ne.s32.totalorder %s1254_s7, 0 }
  0xb0   : > { %s618_s30 = sld [smem:[#allocation3 + $0x3]]  ;;  %v409_v6 = vld [vmem:[%s322_s10] sm:$0xff]  ;;  %v410_v14 = vld [vmem:[%s322_s10 + $0x8] sm:$0xff]  ;;  %s620_s20 = sshll.u32 (%p1256_p6), %s944_s0, 1 }
  0xb1   : > { %s429_s27 = ssub.s32 (%p1256_p6), 3, %s620_s20 }
  0xb2   : > { %p430_p5 = scmp.lt.s32.totalorder (%p1256_p6), %s429_s27, 2 }
  0xb3   : > { %v390_v1 = vstv %s389_s11 }
  0xb4   : > { %v391_v4 = vmul.f32 %v390_v1, %v387_v0  ;;  %v396_v5 = vstv %s616_s13  ;;  %v392_v11 = vmul.f32 %v390_v1, %v388_v7 }
  0xb5   : > { %v397_v9 = vmul.f32 %v396_v5, %v393_v2  ;;  %v404_v10 = vstv %s617_s16  ;;  %v398_v12 = vmul.f32 %v396_v5, %v394_v8 }
  0xb6   : > { %v405_v15 = vmul.f32 %v404_v10, %v401_v3  ;;  %v412_v16 = vstv %s618_s30  ;;  %v406_v17 = vmul.f32 %v404_v10, %v402_v13 }
  0xb7   : > { %v399_v18 = vadd.f32 %v397_v9, %v391_v4  ;;  %v413_v19 = vmul.f32 %v412_v16, %v409_v6  ;;  %v400_v20 = vadd.f32 %v398_v12, %v392_v11  ;;  %v414_v21 = vmul.f32 %v412_v16, %v410_v14 }
  0xb9   : > { %v407_v22 = vadd.f32 %v405_v15, %v399_v18  ;;  %v408_v23 = vadd.f32 %v406_v17, %v400_v20  ;;  %427 = sbr.rel (!%p1256_p6) target bundleno = 217 (0xd9), region = 56 }
  0xbb   : > { %v415_v24 = vadd.f32 %v413_v19, %v407_v22  ;;  %v416_v25 = vadd.f32 %v414_v21, %v408_v23 }
  0xbd   : > { %418 = vst.msk [vmem:[%s361_s6] sm:$0xff] %vm417_vm0, %v415_v24  ;;  %419 = vst.msk [vmem:[%s361_s6 + $0x8] sm:$0xff] %vm417_vm0, %v416_v25 }
  0xbe   : > { %s1272_s27 = smov (!%p430_p5, %s429_s27), 2 }
  0xbf   : > { %s1188_s28 = sshll.u32 %s1272_s27, 7 }
  0xc0   : > { %s434_s12 = ssub.s32 256, %s1188_s28 }
  0xc1   : > { %435 = vsyncadd %s421_s15, %s434_s12  ;;  %p622_p13 = scmp.ne.s32.totalorder %s1188_s28, 0  ;;  %s632_s19 = sshll.u32 %s944_s0, 8 }
  0xc2   : > { %s1198_s25 = scalar_lea.hbm %s1250_s5, %s632_s19  ;;  %s440_s17 = sshll.u32 %s361_s6, 4  ;;  %s1200_s17 = int_to_ptr.vmem [resolvable:$true] %s440_s17 }
  0xc3   : > { %s798_s9 = scalar_lea.vmem %s1200_s17, %s1188_s28  ;;  %s887_s10 = smov [#allocation12]  }
  0xc4   : > { %p799_p4 = scmp.ne.s32.totalorder %s1200_s17, %s798_s9  ;;  %s802_s11 = sshll.u32 %s887_s10, 4  ;;  %s803_s11 = int_to_ptr.vmem [resolvable:$false] %s802_s11 }
  0xc5   : > { %s804_s0 = scalar_lea.vmem %s803_s11, 512  ;;  %p805_p8 = scmp.lt.s32.totalorder %s1200_s17, %s803_s11 }
  0xc6   : > { %p800_p2 = pnand %p799_p4, %p622_p13  ;;  %p806_p0 = scmp.lt.s32.totalorder %s804_s0, %s798_s9 }
  0xc8   : > { %p801_p7 = pneg %p800_p2  ;;  %p807_p12 = por %p806_p0, %p805_p8 }
  0xca   : > { %p808_p10 = pnand %p807_p12, %p801_p7 }
  0xcc   : > { %811 = shalt.err (!%p808_p10)
}
  0xcd   : > { %s812_s13 = scalar_lea.hbm %s1198_s25, %s1188_s28  ;;  %s816_s6 = scalar_lea.hbm %s1250_s5, 384 }
  0xce   : > { %p813_p1 = scmp.ne.s32.totalorder %s1198_s25, %s812_s13  ;;  %p817_p11 = scmp.lt.s32.totalorder %s1198_s25, %s1250_s5 }
  0xcf   : > { %p818_p6 = scmp.lt.s32.totalorder %s816_s6, %s812_s13 }
  0xd0   : > { %p814_p3 = pnand %p813_p1, %p622_p13 }
  0xd1   : > { %p819_p5 = por %p818_p6, %p817_p11 }
  0xd2   : > { %p815_p9 = pneg %p814_p3 }
  0xd4   : > { %p820_p4 = pnand %p819_p5, %p815_p9 }
  0xd6   : > { %823 = shalt.err (!%p820_p4)
}
  0xd7   : > { %s888_s12 = smov 128   ;;  %s889_s19 = smov 8  }
  0xd8   : > { %446 = dma.vmem_to_hbm [thread:$0]  (%p622_p13), %s1200_s17, %s1188_s28, %s1198_s25, %s421_s15, %s888_s12, %s888_s12, %s889_s19  }
  0xd9 PF: > { %s455_s7 = sand.u32 1, %s860_s21   ;;  %p1257_p2 = scmp.ne.s32.totalorder %s1255_s8, 0 }
  0xda   : > { %p1258_p7 = scmp.ge.s32.totalorder %s872_s24, 2  ;;  %s456_s14 = scalar_lea.sflag [#allocation6], %s455_s7 }
  0xdc   : > { %p639_p8 = pnand %p1258_p7, %p1257_p2 }
  0xde   : > { %p640_p0 = pneg %p639_p8 }
  0xe0   : > { %855 = dma.done.wait (%p640_p0), %s456_s14, 256  }
  0xe1   : > { %857 = vsyncadd (%p640_p0), %s456_s14, 4294967040  ;;  %p28_p12 = scmp.ge.s32.totalorder %s948_s26, 4   ;;  %s1259_s21 = smov %s864_s22 }
  0xe2   : > { %s1260_s22 = smov %s868_s23  ;;  %s1261_s23 = smov %s960_s29 }
  0xe3   : > { %s1262_s24 = smov %s948_s26  ;;  %30 = sbr.rel (!%p28_p12) target bundleno = 14 (0xe), region = 118 }
  0xe8   :  { %461 = vsyncpa [#allocation5], 1 }
  0xe9   :  { %463 = vsyncpa [#allocation5 + $0x1], 1 }
  0xea   :  { %464 = vsyncpa [#allocation8], 1 }
  0xeb   :  { %466 = vsyncpa [#allocation8 + $0x1], 1 }
  0xec   :  { %467 = vsyncpa [#allocation11], 1 }
  0xed   :  { %469 = vsyncpa [#allocation11 + $0x1], 1 }
  0xee   :  { %470 = vsyncpa [#allocation6], 1 }
  0xef   :  { %472 = vsyncpa [#allocation6 + $0x1], 1 }

</bundles_post_ra>
